<compile_context>
chip_gen: v7x
topology: tpu7x:2x2x1
jax: 0.10.0
libtpu: 0.0.40
codegen_flags: <defaults>
</compile_context>

<pallas_src>
import functools

import jax
import jax.numpy as jnp
from jax.experimental import pallas as pl
from jax.experimental.pallas import tpu as pltpu

EPS = 1e-07


def _round_up(v, m):
    return ((v + m - 1) // m) * m


def _dice_partial_kernel(x_ref, t_ref, o_ref, *, rows_hw, thw, grid_r, lanes,
                         exact):
    """Accumulates per-(split, sample) partial sums into o_ref (3, 8, lanes).

    o_ref[0] += slab-sum of x * t
    o_ref[1] += slab-sum of x
    o_ref[2] += slab-sum of t
    The fused output block is resident across the reduction axis (grid axis 2).
    """
    s = pl.program_id(0)
    r = pl.program_id(2)

    @pl.when(r == 0)
    def _init():
        o_ref[...] = jnp.zeros_like(o_ref)

    def _accumulate(x, t):
        # Slab reduction: only VPU adds of (8, lanes) vregs (no per-tile XLU).
        o_ref[0] += (x * t).reshape(-1, 8, lanes).sum(axis=0)
        o_ref[1] += x.reshape(-1, 8, lanes).sum(axis=0)
        o_ref[2] += t.reshape(-1, 8, lanes).sum(axis=0)

    if exact:
        # Every tile is full and every split has exactly grid_r real tiles:
        # no masking / validity logic is even emitted.
        _accumulate(x_ref[...].astype(jnp.float32),
                    t_ref[...].astype(jnp.float32))
    else:
        tile = s * grid_r + r          # global row-tile index for this split
        row0 = tile * thw

        @pl.when(row0 + thw <= rows_hw)        # full tile: unmasked fast path
        def _full():
            _accumulate(x_ref[...].astype(jnp.float32),
                        t_ref[...].astype(jnp.float32))

        @pl.when(jnp.logical_and(row0 < rows_hw, row0 + thw > rows_hw))
        def _partial():                        # last real tile: mask OOB rows
            row_ids = jax.lax.broadcasted_iota(jnp.int32, (thw, lanes), 0)
            keep = row_ids < (rows_hw - row0)
            zero = jnp.zeros((), jnp.float32)
            _accumulate(jnp.where(keep, x_ref[...].astype(jnp.float32), zero),
                        jnp.where(keep, t_ref[...].astype(jnp.float32), zero))
        # Tiles with row0 >= rows_hw (the clamped duplicate fetch of an uneven
        # split) contribute nothing.


def dice_loss_single(inputs_nhwc, targets_onehot_nhwc, *, tile_rows=4096,
                     num_splits=2):
    """Equivalent of DiceLoss._forward for one prediction tensor (NHWC)."""
    assert inputs_nhwc.shape == targets_onehot_nhwc.shape
    assert inputs_nhwc.ndim == 4
    N, H, W, C = inputs_nhwc.shape
    HW = H * W

    # Lane-dense view when possible (classes interleave into 128 lanes so every
    # vreg / DMA is fully used); channels-last view otherwise.  Both views are
    # free row-major reshapes — no pads, no extra HBM traffic.
    lane_dense = (128 % C == 0) and ((HW * C) % 128 == 0)
    lanes = 128 if lane_dense else C
    rows_hw = (HW * C) // lanes

    x = inputs_nhwc.reshape(N, rows_hw, lanes)
    t = targets_onehot_nhwc.reshape(N, rows_hw, lanes)   # any dtype; cast in-kernel

    # Row-tile size: multiple of 8, ~2 MiB of (lane-padded) VMEM per input block
    # so 2 inputs x 2 pipeline buffers fit every chip's scoped-VMEM default.
    itemsize = max(x.dtype.itemsize, t.dtype.itemsize)
    lanes_padded = _round_up(lanes, 128)
    vmem_rows = max(8, ((2 << 20) // (lanes_padded * itemsize)) // 8 * 8)
    thw = min(_round_up(tile_rows, 8), vmem_rows, max(8, (rows_hw // 8) * 8))

    n_tiles = pl.cdiv(rows_hw, thw)
    # Split the reduction range so both v7x TensorCores work even for N == 1.
    n_split = max(1, min(num_splits, n_tiles))
    grid_r = pl.cdiv(n_tiles, n_split)
    exact = (rows_hw % thw == 0) and (n_tiles % n_split == 0)

    kernel = functools.partial(_dice_partial_kernel, rows_hw=rows_hw, thw=thw,
                               grid_r=grid_r, lanes=lanes, exact=exact)

    def in_idx(s, n, r):
        # Clamp so the duplicate tail step of an uneven split stays in bounds
        # (its contribution is skipped in-kernel).
        return (n, jnp.minimum(s * grid_r + r, n_tiles - 1), 0)

    bytes_accessed = (int(x.size) * x.dtype.itemsize
                      + int(t.size) * t.dtype.itemsize
                      + n_split * N * 3 * 8 * lanes * 4)

    acc = pl.pallas_call(
        kernel,
        out_shape=jax.ShapeDtypeStruct((n_split * N, 3, 8, lanes), jnp.float32),
        grid_spec=pltpu.PrefetchScalarGridSpec(
            num_scalar_prefetch=0,
            grid=(n_split, N, grid_r),
            in_specs=[
                pl.BlockSpec((None, thw, lanes), in_idx),
                pl.BlockSpec((None, thw, lanes), in_idx),
            ],
            out_specs=pl.BlockSpec((None, 3, 8, lanes),
                                   lambda s, n, r: (s * N + n, 0, 0, 0)),
        ),
        compiler_params=pltpu.CompilerParams(
            dimension_semantics=("parallel", "parallel", "arbitrary")),
        cost_estimate=pl.CostEstimate(
            flops=4 * N * rows_hw * lanes,
            transcendentals=0,
            bytes_accessed=bytes_accessed),
    )(x, t)

    # Tiny finalize in plain JAX (O(N*C) work): sum the splits, fold to classes.
    acc = acc.reshape(n_split, N, 3, 8, lanes).sum(axis=0)          # (N,3,8,lanes)
    per_class = acc.reshape(N, 3, (8 * lanes) // C, C).sum(axis=2)  # (N,3,C)
    num_p, xs_p, ts_p = per_class[:, 0], per_class[:, 1], per_class[:, 2]

    weights = 1.0 / (jnp.sum(ts_p, axis=0) + EPS) ** 2              # (C,)
    numenator = jnp.sum(num_p * weights[None, :], axis=1)           # (N,)
    denominator = jnp.sum((xs_p + ts_p) * weights[None, :], axis=1)
    loss = 1.0 - 2.0 * (numenator / (denominator + EPS))
    return jnp.mean(loss)


class DiceLossPallas:
    """Mirrors DiceLoss.forward from lib/utils/losses.py (channels-last)."""

    def __init__(self, hyp=None):
        self.hyp = hyp

    def _forward(self, inputs, targets_onehot, smooth=1):
        # NOTE: `smooth` is accepted but unused, exactly like the original
        # PyTorch DiceLoss._forward (its body never references `smooth`).
        del smooth
        if isinstance(inputs, list):
            inputs = inputs[0]
        return dice_loss_single(inputs, targets_onehot)

    def __call__(self, score, target):
        if self.hyp["model"]["num_outputs"] == 1:
            score = [score]
        weights = self.hyp["train"]["loss_balance_weights"]
        assert len(weights) == len(score)
        return sum(w * self._forward(x, target) for w, x in zip(weights, score))


def _reference_single(inputs, targets_onehot):
    """Pure-JAX port of the PyTorch DiceLoss._forward for verification."""
    inputs = inputs.astype(jnp.float32)
    targets_onehot = targets_onehot.astype(jnp.float32)
    w = 1.0 / (jnp.sum(targets_onehot, axis=(0, 1, 2)) + EPS) ** 2
    num = jnp.sum(jnp.sum(targets_onehot * inputs, axis=(1, 2)) * w[None, :], axis=1)
    den = jnp.sum(jnp.sum(targets_onehot + inputs, axis=(1, 2)) * w[None, :], axis=1)
    return jnp.mean(1.0 - 2.0 * (num / (den + EPS)))


if __name__ == "__main__":
    keys = jax.random.split(jax.random.PRNGKey(0), 6)

    # --- main spec-like case: lane-dense path, bf16 one-hot target (half the
    #     target read bytes, lossless for 0/1 values).
    N, H, W, C = 2, 16, 16, 4
    score = jax.random.normal(keys[0], (N, H, W, C), dtype=jnp.float32)
    labels = jax.random.randint(keys[1], (N, H, W), 0, C)
    target = jax.nn.one_hot(labels, C, dtype=jnp.bfloat16)

    hyp = {"model": {"num_outputs": 1},
           "train": {"loss_balance_weights": [1.0]}}
    loss_fn = DiceLossPallas(hyp)
    loss = jax.block_until_ready(loss_fn(score, target))
    ref = 1.0 * _reference_single(score, target)
    assert jnp.allclose(loss, ref, rtol=1e-4, atol=1e-5), (loss, ref)

    # --- ragged last tile + 2-way reduction split (v7x path), lane-dense view.
    N2, H2, W2, C2 = 1, 32, 17, 4            # H*W*C = 2176 -> 17 rows of 128
    x2 = jax.random.normal(keys[2], (N2, H2, W2, C2), dtype=jnp.float32)
    t2 = jax.nn.one_hot(jax.random.randint(keys[3], (N2, H2, W2), 0, C2), C2,
                        dtype=jnp.float32)
    out2 = jax.block_until_ready(dice_loss_single(x2, t2, tile_rows=8))
    ref2 = _reference_single(x2, t2)
    assert jnp.allclose(out2, ref2, rtol=1e-4, atol=1e-5), (out2, ref2)

    # --- general channels-last path (C does not divide 128): no wrapper pads.
    N3, H3, W3, C3 = 2, 20, 5, 3
    x3 = jax.random.normal(keys[4], (N3, H3, W3, C3), dtype=jnp.float32)
    t3 = jax.nn.one_hot(jax.random.randint(keys[5], (N3, H3, W3), 0, C3), C3,
                        dtype=jnp.bfloat16)
    out3 = jax.block_until_ready(dice_loss_single(x3, t3, tile_rows=16))
    ref3 = _reference_single(x3, t3)
    assert jnp.allclose(out3, ref3, rtol=1e-4, atol=1e-5), (out3, ref3)

    print("KERNEL_OK")
</pallas_src>

<mosaic_0001>
module attributes {stable_mosaic.version = 11 : i64} {
  func.func @_dice_partial_kernel(%arg0: i32, %arg1: i32, %arg2: i32, %arg3: memref<1x8x128xf32, #tpu.memory_space<vmem>>, %arg4: memref<1x8x128xbf16, #tpu.memory_space<vmem>>, %arg5: memref<1x3x8x128xf32, #tpu.memory_space<vmem>>) attributes {dimension_semantics = [#tpu.dimension_semantics<parallel>, #tpu.dimension_semantics<parallel>, #tpu.dimension_semantics<arbitrary>], iteration_bounds = array<i64: 1, 2, 1>, scalar_prefetch = 0 : i64, scratch_operands = 0 : i64, tpu.core_type = #tpu.core_type<tc>, window_params = [{transform_indices = @transform_0, window_bounds = array<i64: 1, 8, 128>}, {transform_indices = @transform_1, window_bounds = array<i64: 1, 8, 128>}, {transform_indices = @transform_2, window_bounds = array<i64: 1, 3, 8, 128>}]} {
    %c0_i32 = arith.constant 0 : i32
    %0 = arith.cmpi eq, %arg2, %c0_i32 : i32
    %1 = arith.extui %0 : i1 to i32
    %c0_i32_0 = arith.constant 0 : i32
    %2 = arith.cmpi ne, %1, %c0_i32_0 : i32
    scf.if %2 {
      %cst_30 = arith.constant 0.000000e+00 : f32
      %33 = vector.broadcast %cst_30 : f32 to vector<3x8x128xf32>
      %c0_31 = arith.constant 0 : index
      %c0_32 = arith.constant 0 : index
      %c0_33 = arith.constant 0 : index
      %c0_34 = arith.constant 0 : index
      %34 = vector.load %arg5[%c0_31, %c0_32, %c0_33, %c0_34] : memref<1x3x8x128xf32, #tpu.memory_space<vmem>>, vector<1x3x8x128xf32>
      %35 = vector.shape_cast %34 : vector<1x3x8x128xf32> to vector<3x8x128xf32>
      %36 = vector.shape_cast %33 : vector<3x8x128xf32> to vector<1x3x8x128xf32>
      tpu.vector_store %arg5[%c0_31, %c0_32, %c0_33, %c0_34], %36 {strides = array<i32>} : memref<1x3x8x128xf32, #tpu.memory_space<vmem>>, vector<1x3x8x128xf32>,
    } else {
    }
    %c0 = arith.constant 0 : index
    %c0_1 = arith.constant 0 : index
    %c0_2 = arith.constant 0 : index
    %3 = vector.load %arg3[%c0, %c0_1, %c0_2] : memref<1x8x128xf32, #tpu.memory_space<vmem>>, vector<1x8x128xf32>
    %4 = vector.shape_cast %3 : vector<1x8x128xf32> to vector<8x128xf32>
    %c0_3 = arith.constant 0 : index
    %c0_4 = arith.constant 0 : index
    %c0_5 = arith.constant 0 : index
    %5 = vector.load %arg4[%c0_3, %c0_4, %c0_5] : memref<1x8x128xbf16, #tpu.memory_space<vmem>>, vector<1x8x128xbf16>
    %6 = vector.shape_cast %5 : vector<1x8x128xbf16> to vector<8x128xbf16>
    %7 = arith.extf %6 : vector<8x128xbf16> to vector<8x128xf32>
    %c0_6 = arith.constant 0 : index
    %c0_7 = arith.constant 0 : index
    %c0_8 = arith.constant 0 : index
    %c0_9 = arith.constant 0 : index
    %8 = vector.load %arg5[%c0_6, %c0_7, %c0_8, %c0_9] : memref<1x3x8x128xf32, #tpu.memory_space<vmem>>, vector<1x1x8x128xf32>
    %9 = vector.shape_cast %8 : vector<1x1x8x128xf32> to vector<8x128xf32>
    %10 = arith.mulf %4, %7 : vector<8x128xf32>
    %11 = vector.shape_cast %10 : vector<8x128xf32> to vector<1x8x128xf32>
    %cst = arith.constant dense<0.000000e+00> : vector<8x128xf32>
    %12 = vector.multi_reduction <add>, %11, %cst [0] : vector<1x8x128xf32> to vector<8x128xf32>
    %13 = arith.addf %9, %12 : vector<8x128xf32>
    %c0_10 = arith.constant 0 : index
    %c0_11 = arith.constant 0 : index
    %c0_12 = arith.constant 0 : index
    %c0_13 = arith.constant 0 : index
    %14 = vector.load %arg5[%c0_10, %c0_11, %c0_12, %c0_13] : memref<1x3x8x128xf32, #tpu.memory_space<vmem>>, vector<1x1x8x128xf32>
    %15 = vector.shape_cast %14 : vector<1x1x8x128xf32> to vector<8x128xf32>
    %16 = vector.shape_cast %13 : vector<8x128xf32> to vector<1x1x8x128xf32>
    tpu.vector_store %arg5[%c0_10, %c0_11, %c0_12, %c0_13], %16 {strides = array<i32>} : memref<1x3x8x128xf32, #tpu.memory_space<vmem>>, vector<1x1x8x128xf32>,
    %c0_14 = arith.constant 0 : index
    %c1 = arith.constant 1 : index
    %c0_15 = arith.constant 0 : index
    %c0_16 = arith.constant 0 : index
    %17 = vector.load %arg5[%c0_14, %c1, %c0_15, %c0_16] : memref<1x3x8x128xf32, #tpu.memory_space<vmem>>, vector<1x1x8x128xf32>
    %18 = vector.shape_cast %17 : vector<1x1x8x128xf32> to vector<8x128xf32>
    %19 = vector.shape_cast %4 : vector<8x128xf32> to vector<1x8x128xf32>
    %cst_17 = arith.constant dense<0.000000e+00> : vector<8x128xf32>
    %20 = vector.multi_reduction <add>, %19, %cst_17 [0] : vector<1x8x128xf32> to vector<8x128xf32>
    %21 = arith.addf %18, %20 : vector<8x128xf32>
    %c0_18 = arith.constant 0 : index
    %c1_19 = arith.constant 1 : index
    %c0_20 = arith.constant 0 : index
    %c0_21 = arith.constant 0 : index
    %22 = vector.load %arg5[%c0_18, %c1_19, %c0_20, %c0_21] : memref<1x3x8x128xf32, #tpu.memory_space<vmem>>, vector<1x1x8x128xf32>
    %23 = vector.shape_cast %22 : vector<1x1x8x128xf32> to vector<8x128xf32>
    %24 = vector.shape_cast %21 : vector<8x128xf32> to vector<1x1x8x128xf32>
    tpu.vector_store %arg5[%c0_18, %c1_19, %c0_20, %c0_21], %24 {strides = array<i32>} : memref<1x3x8x128xf32, #tpu.memory_space<vmem>>, vector<1x1x8x128xf32>,
    %c0_22 = arith.constant 0 : index
    %c2 = arith.constant 2 : index
    %c0_23 = arith.constant 0 : index
    %c0_24 = arith.constant 0 : index
    %25 = vector.load %arg5[%c0_22, %c2, %c0_23, %c0_24] : memref<1x3x8x128xf32, #tpu.memory_space<vmem>>, vector<1x1x8x128xf32>
    %26 = vector.shape_cast %25 : vector<1x1x8x128xf32> to vector<8x128xf32>
    %27 = vector.shape_cast %7 : vector<8x128xf32> to vector<1x8x128xf32>
    %cst_25 = arith.constant dense<0.000000e+00> : vector<8x128xf32>
    %28 = vector.multi_reduction <add>, %27, %cst_25 [0] : vector<1x8x128xf32> to vector<8x128xf32>
    %29 = arith.addf %26, %28 : vector<8x128xf32>
    %c0_26 = arith.constant 0 : index
    %c2_27 = arith.constant 2 : index
    %c0_28 = arith.constant 0 : index
    %c0_29 = arith.constant 0 : index
    %30 = vector.load %arg5[%c0_26, %c2_27, %c0_28, %c0_29] : memref<1x3x8x128xf32, #tpu.memory_space<vmem>>, vector<1x1x8x128xf32>
    %31 = vector.shape_cast %30 : vector<1x1x8x128xf32> to vector<8x128xf32>
    %32 = vector.shape_cast %29 : vector<8x128xf32> to vector<1x1x8x128xf32>
    tpu.vector_store %arg5[%c0_26, %c2_27, %c0_28, %c0_29], %32 {strides = array<i32>} : memref<1x3x8x128xf32, #tpu.memory_space<vmem>>, vector<1x1x8x128xf32>,
    return
  }
  func.func @transform_0(%arg0: i32, %arg1: i32, %arg2: i32) -> (i32, i32, i32) {
    %c1_i32 = arith.constant 1 : i32
    %0 = arith.muli %arg0, %c1_i32 : i32
    %1 = arith.addi %0, %arg2 : i32
    %c0_i32 = arith.constant 0 : i32
    %2 = arith.minsi %1, %c0_i32 : i32
    %c0_i32_0 = arith.constant 0 : i32
    %c0_i32_1 = arith.constant 0 : i32
    return %arg1, %2, %c0_i32_0 : i32, i32, i32
  }
  func.func @transform_1(%arg0: i32, %arg1: i32, %arg2: i32) -> (i32, i32, i32) {
    %c1_i32 = arith.constant 1 : i32
    %0 = arith.muli %arg0, %c1_i32 : i32
    %1 = arith.addi %0, %arg2 : i32
    %c0_i32 = arith.constant 0 : i32
    %2 = arith.minsi %1, %c0_i32 : i32
    %c0_i32_0 = arith.constant 0 : i32
    %c0_i32_1 = arith.constant 0 : i32
    return %arg1, %2, %c0_i32_0 : i32, i32, i32
  }
  func.func @transform_2(%arg0: i32, %arg1: i32, %arg2: i32) -> (i32, i32, i32, i32) {
    %c2_i32 = arith.constant 2 : i32
    %0 = arith.muli %arg0, %c2_i32 : i32
    %1 = arith.addi %0, %arg1 : i32
    %c0_i32 = arith.constant 0 : i32
    %c0_i32_0 = arith.constant 0 : i32
    %c0_i32_1 = arith.constant 0 : i32
    %c0_i32_2 = arith.constant 0 : i32
    return %1, %c0_i32, %c0_i32_0, %c0_i32_1 : i32, i32, i32, i32
  }
}

</mosaic_0001>

<bundles_post_ra>
// kernel: tpu_custom_call.1
= control target key start
LH: loop header
LB: loop body
LE: loop exit
PB: predicated region body
PF: predicated region fallthrough
CT: control target
= control target key end

     0   :  { %7 = vsyncpa [#allocation3], 0  ;;  %s879_s0 = inlined_call_operand.hbm [shape: f32[2,8,128], index: 0, kind: input, shape index: {}]   ;;  %s880_s1 = inlined_call_operand.hbm [shape: bf16[2,8,128], index: 1, kind: input, shape index: {}]   ;;  %s881_s2 = inlined_call_operand.hbm [shape: f32[2,3,8,128], index: 2, kind: output, shape index: {}]  }
   0x1   :  { %9 = vsyncpa [#allocation3 + $0x1], 0 }
   0x2   :  { %10 = vsyncpa [#allocation6], 0 }
   0x3   :  { %12 = vsyncpa [#allocation6 + $0x1], 0 }
   0x4   :  { %13 = vsyncpa [#allocation4], 0 }
   0x5   :  { %15 = vsyncpa [#allocation4 + $0x1], 0  ;;  %s661_s9 = smov 0   ;;  %s663_s10 = smov 0  }
   0x6   :  { %s665_s11 = smov 0   ;;  %s667_s12 = smov 0  }
   0x7   :  { %s669_s13 = smov 0   ;;  %s671_s14 = smov 0  }
   0x8 LB: > { %s403_s15 = sadd.s32 4294967295, %s639_s14   ;;  %s404_s16 = sadd.s32 4294967294, %s639_s14   ;;  %s639_s14 = sphi %s671_s14, %s21_s14   ;;  %s635_s13 = sphi %s669_s13, %s901_s13   ;;  %s631_s12 = sphi %s667_s12, %s900_s12   ;;  %s627_s11 = sphi %s665_s11, %s899_s11   ;;  %s623_s10 = sphi %s663_s10, %s898_s10   ;;  %s619_s9 = sphi %s661_s9, %s897_s9  }
   0x9   : > { %s36_s17 = sadd.s32 1, %s635_s13  ;;  %s55_s18 = sadd.s32 1, %s627_s11 }
   0xa   : > { %p38_p0 = scmp.ge.s32.totalorder %s36_s17, 2  ;;  %p62_p1 = scmp.ne.s32.totalorder %s627_s11, %s623_s10 }
   0xb   : > { %p63_p2 = scmp.eq.s32.totalorder %s639_s14, 0  ;;  %p68_p3 = scmp.ne.s32.totalorder %s623_s10, %s619_s9 }
   0xc   : > { %s903_s17 = smov (%p38_p0, %s36_s17), 0  ;;  %p69_p5 = scmp.eq.s32.totalorder %s403_s15, 0 }
   0xd   : > { %p702_p4 = por %p63_p2, %p62_p1  ;;  %s50_s20 = ssub.s32 %s635_s13, %s903_s17 }
   0xe   : > { %p130_p6 = scmp.eq.s32.totalorder %s403_s15, 1  ;;  %p53_p7 = scmp.eq.s32.totalorder %s50_s20, 0 }
   0xf   : > { %p708_p8 = por %p69_p5, %p68_p3  ;;  %p136_p10 = scmp.eq.s32.totalorder %s404_s16, 1 }
  0x10   : > { %p712_p9 = por %p130_p6, %p62_p1  ;;  %p440_p13 = scmp.lt.s32.totalorder %s639_s14, 2 }
  0x11   : > { %s885_s21 = scalar_select %p708_p8, 1, 0 }
  0x12   : > { %s886_s22 = scalar_select %p712_p9, 1, 0 }
  0x13   : > { %s717_s23 = scalar_select %p53_p7, %s627_s11, %s55_s18  }
  0x14   : > { %p719_p11 = por %p136_p10, %p68_p3  ;;  %s726_s25 = sand.u32 1, %s627_s11  }
  0x15   : > { %s407_s26 = sshll.u32 %s726_s25, 3  ;;  %s408_s27 = sshll.u32 %s635_s13, 7 }
  0x16   : > { %s887_s24 = scalar_select %p719_p11, 1, 0 }
  0x17   : > { %s733_s30 = scalar_lea.hbm %s879_s0, %s408_s27  ;;  %s160_s3 = scalar_lea.vmem [#allocation2], %s407_s26 }
  0x18   : > { %s171_s4 = sshll.u32 %s160_s3, 4  ;;  %p739_p0 = pnand %p440_p13, %p702_p4  ;;  %s735_s4 = int_to_ptr.vmem [resolvable:$true] %s171_s4 }
  0x19   : > { %s157_s6 = scalar_lea.sflag [#allocation3], %s726_s25  ;;  %s493_s7 = scalar_lea.hbm %s733_s30, 128 }
  0x1a   : > { %p494_p3 = scmp.ne.s32.totalorder %s733_s30, %s493_s7  ;;  %p495_p5 = pneg %p739_p0 }
  0x1b   : > { %s498_s16 = scalar_lea.hbm %s879_s0, 256  ;;  %p499_p4 = scmp.lt.u32.totalorder %s733_s30, %s879_s0 }
  0x1c   : > { %p496_p6 = pnand %p495_p5, %p494_p3  ;;  %p500_p10 = scmp.lt.u32.totalorder %s498_s16, %s493_s7 }
  0x1d   : > { %p502_p12 = scmp.lt.u32.totalorder %s493_s7, %s733_s30 }
  0x1e   : > { %p497_p7 = pneg %p496_p6  ;;  %p501_p13 = por %p500_p10, %p499_p4 }
  0x20   : > { %p503_p1 = por %p502_p12, %p501_p13 }
  0x22   : > { %p504_p2 = pnand %p503_p1, %p497_p7 }
  0x24   : > { %507 = shalt.err (!%p504_p2)
}
  0x25   : > { %s508_s20 = scalar_lea.vmem %s735_s4, 128  ;;  %s641_s26 = smov [#allocation2]  }
  0x26   : > { %p509_p3 = scmp.ne.s32.totalorder %s735_s4, %s508_s20  ;;  %s513_s27 = sshll.u32 %s641_s26, 4  ;;  %s514_s27 = int_to_ptr.vmem [resolvable:$false] %s513_s27 }
  0x27   : > { %s515_s28 = scalar_lea.vmem %s514_s27, 256  ;;  %p516_p9 = scmp.lt.s32.totalorder %s735_s4, %s514_s27 }
  0x28   : > { %p511_p6 = pnand %p509_p3, %p495_p5  ;;  %p517_p4 = scmp.lt.s32.totalorder %s515_s28, %s508_s20 }
  0x2a   : > { %p512_p11 = pneg %p511_p6  ;;  %p518_p10 = por %p517_p4, %p516_p9 }
  0x2c   : > { %p519_p12 = pnand %p518_p10, %p512_p11 }
  0x2e   : > { %522 = shalt.err (!%p519_p12)
}
  0x2f   : > { %432 = dma.hbm_to_vmem [thread:$0]  (!%p739_p0), %s733_s30, 128, %s735_s4, %s157_s6  }
  0x30   : > { %p889_p1 = scmp.lt.s32.totalorder %s639_s14, 3  ;;  %p890_p2 = scmp.ge.s32.totalorder %s639_s14, 1 }
  0x31   : > { %s409_s3 = sshll.u32 %s726_s25, 2  ;;  %s410_s7 = sshll.u32 %s635_s13, 6 }
  0x32   : > { %p775_p7 = pnand %p890_p2, %p889_p1  ;;  %s784_s16 = scalar_lea.hbm %s880_s1, %s410_s7 }
  0x33   : > { %s182_s18 = scalar_lea.vmem [#allocation5], %s409_s3  ;;  %s179_s30 = scalar_lea.sflag [#allocation6], %s726_s25 }
  0x34   : > { %s891_s29 = scalar_select %p775_p7, 1, 0 }
  0x35   : > { %s193_s19 = sshll.u32 %s182_s18, 4  ;;  %s523_s4 = scalar_lea.hbm %s784_s16, 64  ;;  %s194_s19 = int_to_ptr.vmem [resolvable:$true] %s193_s19 }
  0x36   : > { %p524_p9 = scmp.ne.s32.totalorder %s784_s16, %s523_s4  ;;  %s528_s26 = scalar_lea.hbm %s880_s1, 128 }
  0x37   : > { %p529_p3 = scmp.lt.u32.totalorder %s784_s16, %s880_s1  ;;  %p530_p6 = scmp.lt.u32.totalorder %s528_s26, %s523_s4 }
  0x38   : > { %p526_p11 = pnand %p524_p9, %p495_p5  ;;  %p532_p10 = scmp.lt.u32.totalorder %s523_s4, %s784_s16 }
  0x39   : > { %p531_p4 = por %p530_p6, %p529_p3 }
  0x3a   : > { %p527_p13 = pneg %p526_p11 }
  0x3b   : > { %p533_p12 = por %p532_p10, %p531_p4 }
  0x3d   : > { %p534_p1 = pnand %p533_p12, %p527_p13 }
  0x3f   : > { %537 = shalt.err (!%p534_p1)
}
  0x40   : > { %s538_s25 = scalar_lea.vmem %s194_s19, 64  ;;  %s642_s3 = smov [#allocation5]  }
  0x41   : > { %p539_p2 = scmp.ne.s32.totalorder %s194_s19, %s538_s25  ;;  %s543_s7 = sshll.u32 %s642_s3, 4  ;;  %s544_s7 = int_to_ptr.vmem [resolvable:$false] %s543_s7 }
  0x42   : > { %s545_s8 = scalar_lea.vmem %s544_s7, 128  ;;  %p546_p8 = scmp.lt.s32.totalorder %s194_s19, %s544_s7 }
  0x43   : > { %p541_p9 = pnand %p539_p2, %p495_p5  ;;  %p547_p7 = scmp.lt.s32.totalorder %s545_s8, %s538_s25 }
  0x45   : > { %p542_p11 = pneg %p541_p9  ;;  %p548_p3 = por %p547_p7, %p546_p8 }
  0x47   : > { %p549_p6 = pnand %p548_p3, %p542_p11 }
  0x49   : > { %552 = shalt.err (!%p549_p6)
}
  0x4a   : > { %435 = dma.hbm_to_vmem [thread:$0]  (!%p739_p0), %s784_s16, 64, %s194_s19, %s179_s30  }
  0x4b   : > { %p892_p13 = scmp.ne.s32.totalorder %s891_s29, 0 }
  0x4c   : > { %s809_s15 = sand.u32 (!%p892_p13), 1, %s623_s10   ;;  %p893_p5 = scmp.ne.s32.totalorder (!%p892_p13), %s885_s21, 0 }
  0x4d   : > { %202 = sbr.rel (%p892_p13) target bundleno = 115 (0x73), region = 28  ;;  %s412_s18 = sshll.u32 (!%p892_p13), %s809_s15, 3 }
  0x4e   : > { %s205_s4 = scalar_lea.sflag (!%p892_p13), [#allocation3], %s809_s15  ;;  %s208_s6 = scalar_lea.vmem (!%p892_p13), [#allocation2], %s412_s18 }
  0x54   : > { %606 = dma.done.wait (%p893_p5), %s205_s4, 128  }
  0x55   : > { %608 = vsyncadd (%p893_p5), %s205_s4, 4294967168  ;;  %s413_s5 = sshll.u32 %s809_s15, 2  ;;  %s214_s29 = scalar_lea.sflag [#allocation6], %s809_s15 }
  0x56   : > { %s217_s16 = scalar_lea.vmem [#allocation5], %s413_s5 }
  0x57   : > { %610 = dma.done.wait (%p893_p5), %s214_s29, 64  }
  0x58   : > { %612 = vsyncadd (%p893_p5), %s214_s29, 4294967232  ;;  %s421_s19 = smul.u32 24, %s809_s15  ;;  %v258_v0 = vld [vmem:[%s208_s6] sm:$0xff]  ;;  %v259_v1 = vld [vmem:[%s217_s16] sm:$0xf]  ;;  %s277_s21 = scalar_lea.sflag [#allocation4], %s809_s15 }
  0x59   : > { %v260_v2 = vunpack.c.l.bf16 %v259_v1  ;;  %s422_s30 = smul.u32 384, %s631_s12  ;;  %p894_p0 = scmp.ne.s32.totalorder %s886_s22, 0 }
  0x5a   : > { %s242_s20 = scalar_lea.vmem [#allocation7], %s421_s19  ;;  %s643_s12 = smov [#allocation7]  }
  0x5b   : > { %s292_s26 = sshll.u32 %s242_s20, 4  ;;  %v262_v3 = vmul.f32 %v260_v2, %v258_v0  ;;  %415 = vst [vmem:[%s242_s20 + $0x8] sm:$0xff] %v258_v0  ;;  %417 = vst [vmem:[%s242_s20 + $0x10] sm:$0xff] %v260_v2  ;;  %s828_s25 = scalar_lea.hbm %s881_s2, %s422_s30  ;;  %s830_s26 = int_to_ptr.vmem [resolvable:$true] %s292_s26 }
  0x5c   : > { %s553_s3 = scalar_lea.vmem %s830_s26, 384  ;;  %s557_s7 = sshll.u32 %s643_s12, 4  ;;  %s558_s7 = int_to_ptr.vmem [resolvable:$false] %s557_s7 }
  0x5d   : > { %265 = vst [vmem:[%s242_s20] sm:$0xff] %v262_v3  ;;  %p554_p8 = scmp.ne.s32.totalorder %s830_s26, %s553_s3  ;;  %s559_s8 = scalar_lea.vmem %s558_s7, 768 }
  0x5e   : > { %p560_p10 = scmp.lt.s32.totalorder %s830_s26, %s558_s7  ;;  %p561_p12 = scmp.lt.s32.totalorder %s559_s8, %s553_s3 }
  0x5f   : > { %p555_p7 = pnand %p554_p8, %p894_p0 }
  0x60   : > { %p562_p1 = por %p561_p12, %p560_p10 }
  0x61   : > { %p556_p4 = pneg %p555_p7 }
  0x63   : > { %p563_p2 = pnand %p562_p1, %p556_p4 }
  0x65   : > { %566 = shalt.err (!%p563_p2)
}
  0x66   : > { %s567_s18 = scalar_lea.hbm %s828_s25, 384  ;;  %s571_s5 = scalar_lea.hbm %s881_s2, 768 }
  0x67   : > { %p568_p9 = scmp.ne.s32.totalorder %s828_s25, %s567_s18  ;;  %p572_p6 = scmp.lt.u32.totalorder %s828_s25, %s881_s2 }
  0x68   : > { %p573_p13 = scmp.lt.u32.totalorder %s571_s5, %s567_s18  ;;  %p575_p8 = scmp.lt.u32.totalorder %s567_s18, %s828_s25 }
  0x69   : > { %p569_p11 = pnand %p568_p9, %p894_p0 }
  0x6a   : > { %p574_p5 = por %p573_p13, %p572_p6 }
  0x6b   : > { %p570_p3 = pneg %p569_p11 }
  0x6c   : > { %p576_p7 = por %p575_p8, %p574_p5 }
  0x6e   : > { %p577_p4 = pnand %p576_p7, %p570_p3 }
  0x70   : > { %580 = shalt.err (!%p577_p4)
}
  0x71   : > { %s644_s19 = smov 128   ;;  %s645_s30 = smov 8  }
  0x72   : > { %427 = dma.vmem_to_hbm [thread:$0]  (%p894_p0), %s830_s26, 384, %s828_s25, %s277_s21, %s644_s19, %s644_s19, %s645_s30  }
  0x73 PF: > { %s307_s20 = sand.u32 1, %s619_s9   ;;  %p895_p10 = scmp.ne.s32.totalorder %s887_s24, 0 }
  0x74   : > { %p896_p12 = scmp.ge.s32.totalorder %s639_s14, 2  ;;  %s308_s27 = scalar_lea.sflag [#allocation4], %s307_s20 }
  0x76   : > { %p437_p1 = pnand %p896_p12, %p895_p10 }
  0x78   : > { %614 = dma.done.wait (!%p437_p1), %s308_s27, 384  }
  0x79   : > { %616 = vsyncadd (!%p437_p1), %s308_s27, 4294966912  ;;  %s21_s14 = sadd.s32 1, %s639_s14   ;;  %s897_s9 = smov %s623_s10 }
  0x7a   : > { %p18_p2 = scmp.ge.s32.totalorder %s21_s14, 4   ;;  %s898_s10 = smov %s627_s11 }
  0x7b   : > { %s899_s11 = smov %s717_s23  ;;  %s900_s12 = smov %s635_s13 }
  0x7c   : > { %s901_s13 = smov %s903_s17  ;;  %20 = sbr.rel (!%p18_p2) target bundleno = 8 (0x8), region = 92 }
  0x83   :  { %313 = vsyncpa [#allocation3], 1 }
  0x84   :  { %315 = vsyncpa [#allocation3 + $0x1], 1 }
  0x85   :  { %316 = vsyncpa [#allocation6], 1 }
  0x86   :  { %318 = vsyncpa [#allocation6 + $0x1], 1 }
  0x87   :  { %319 = vsyncpa [#allocation4], 1 }
  0x88   :  { %321 = vsyncpa [#allocation4 + $0x1], 1 }

</bundles_post_ra>
